<compile_context>
chip_gen: v6e
topology: v6e:2x2x1
jax: 0.10.0
libtpu: 0.0.40
codegen_flags: <defaults>
</compile_context>

<pallas_src>
import jax
import jax.numpy as jnp
import numpy as np
from jax.experimental import pallas as pl
from jax.experimental.pallas import tpu as pltpu


# ---------------------------------------------------------------------------
# Parameter repacking (one-time, outside the forward pass)
# ---------------------------------------------------------------------------
def _block_diag(blocks):
    """[C, m, n] -> block-diagonal [C*m, C*n]."""
    C, m, n = blocks.shape
    eye = jnp.eye(C, dtype=blocks.dtype)
    return jnp.einsum("cij,cd->cidj", blocks, eye).reshape(C * m, C * n)


def prepare_params(params, state_dim, embedding_dim, hidden_dim):
    """Repack EnsembleLinear weights so the whole ensemble runs as a handful
    of full-width matmuls (N = critic_num * hidden_dim lanes)."""
    w1, b1, w2, b2, w3, b3, w4, b4 = params
    C, _, H = w1.shape
    E = embedding_dim

    def cat_out(w):  # [C, K, N] -> [K, C*N] (concat critics along output axis)
        return jnp.transpose(w, (1, 0, 2)).reshape(w.shape[1], C * w.shape[2])

    w1_cat = cat_out(w1)                             # [S+A, CH]
    w1_s, w1_a = w1_cat[:state_dim], w1_cat[state_dim:]
    b1_cat = cat_out(b1)                             # [1, CH]

    # torch concat order inside layers[0] is [h | zsa | zs]
    w2h_bd = _block_diag(w2[:, :H, :])               # [CH, CH]
    w2zsa_cat = cat_out(w2[:, H:H + E, :])           # [E, CH]
    w2zs_cat = cat_out(w2[:, H + E:, :])             # [E, CH]
    b2_cat = cat_out(b2)                             # [1, CH]

    w3_bd = _block_diag(w3)                          # [CH, CH]
    b3_cat = cat_out(b3)                             # [1, CH]

    w4_bd = _block_diag(w4)                          # [CH, C]
    b4_cat = b4.reshape(1, C)                        # [1, C]

    # Block-averaging mask: (|h| @ avg_mask)[b, lane-in-block-c] = mean_c |h|
    avg_mask = _block_diag(jnp.full((C, H, H), 1.0 / H, jnp.float32))  # [CH, CH]

    return (w1_s, w1_a, b1_cat, avg_mask,
            w2h_bd, w2zsa_cat, w2zs_cat, b2_cat,
            w3_bd, b3_cat, w4_bd, b4_cat)


# ---------------------------------------------------------------------------
# Kernel
# ---------------------------------------------------------------------------
def td7_critic_kernel(state_ref, action_ref, zsa_ref, zs_ref,
                      w1s_ref, w1a_ref, b1_ref, avg_ref,
                      w2h_ref, w2zsa_ref, w2zs_ref, b2_ref,
                      w3_ref, b3_ref, w4_ref, b4_ref,
                      out_ref):
    eps = 1e-8
    f32 = jnp.float32

    # ---- sa_layers: EnsembleLinear(state+action -> H), all critics at once
    #      (K split over state / action instead of a wrapper-side concat).
    h = (jnp.dot(state_ref[...], w1s_ref[...], preferred_element_type=f32)
         + jnp.dot(action_ref[...], w1a_ref[...], preferred_element_type=f32)
         + b1_ref[...])                                           # [TB, CH]

    # ---- AvgL1Norm per critic: |h| @ avg_mask broadcasts each critic's own
    #      mean|h| across its 64 lanes (one MXU push, no cross-lane reshape);
    #      the divide is an EUP vrcp.
    denom = jnp.maximum(
        jnp.dot(jnp.abs(h), avg_ref[...], preferred_element_type=f32), eps)
    h = h * pl.reciprocal(denom, approx=True)

    # ---- layers[0]: concat([h, zsa, zs]) @ W2 == h@W2h_bd + zsa@W2zsa + zs@W2zs
    x = (jnp.dot(h, w2h_ref[...], preferred_element_type=f32)
         + jnp.dot(zsa_ref[...], w2zsa_ref[...], preferred_element_type=f32)
         + jnp.dot(zs_ref[...], w2zs_ref[...], preferred_element_type=f32)
         + b2_ref[...])
    x = jnp.maximum(x, 0.0)                                       # ReLU

    # ---- layers[2]: EnsembleLinear(H -> H), block-diagonal -> one push
    x = jnp.maximum(
        jnp.dot(x, w3_ref[...], preferred_element_type=f32) + b3_ref[...], 0.0)

    # ---- layers[4]: EnsembleLinear(H -> 1), block-diagonal [CH, C] -> one
    #      [TB, C] push instead of C separate N=1 matmuls; lane-dense store.
    out_ref[...] = (jnp.dot(x, w4_ref[...], preferred_element_type=f32)
                    + b4_ref[...])


# ---------------------------------------------------------------------------
# Wrapper
# ---------------------------------------------------------------------------
def td7_critic_forward(state, action, zsa, zs, prepped):
    """Pallas forward. Returns [critic_num, B, 1] float32."""
    (w1_s, w1_a, b1_cat, avg_mask,
     w2h_bd, w2zsa_cat, w2zs_cat, b2_cat,
     w3_bd, b3_cat, w4_bd, b4_cat) = prepped

    B, S = state.shape
    A = action.shape[1]
    E = zsa.shape[1]
    C = w4_bd.shape[1]

    def round_up(x, m):
        return (x + m - 1) // m * m

    # Batch tiling: weights stay resident (constant index_map); the batch axis
    # is "parallel" so v7x's two TensorCores split it and the activation
    # stream double-buffers at large B.
    TB = min(round_up(B, 8), 256)
    Bp = round_up(B, TB)
    if Bp != B:
        pad = Bp - B
        state = jnp.pad(state, ((0, pad), (0, 0)))
        action = jnp.pad(action, ((0, pad), (0, 0)))
        zsa = jnp.pad(zsa, ((0, pad), (0, 0)))
        zs = jnp.pad(zs, ((0, pad), (0, 0)))

    def batch_spec(cols):
        return pl.BlockSpec((TB, cols), lambda i: (i, 0))

    def resident(arr):
        return pl.BlockSpec(arr.shape, lambda i: (0, 0))

    out = pl.pallas_call(
        td7_critic_kernel,
        out_shape=jax.ShapeDtypeStruct((Bp, C), jnp.float32),
        grid_spec=pltpu.PrefetchScalarGridSpec(
            num_scalar_prefetch=0,
            grid=(Bp // TB,),
            in_specs=[batch_spec(S), batch_spec(A), batch_spec(E), batch_spec(E),
                      resident(w1_s), resident(w1_a), resident(b1_cat),
                      resident(avg_mask),
                      resident(w2h_bd), resident(w2zsa_cat), resident(w2zs_cat),
                      resident(b2_cat),
                      resident(w3_bd), resident(b3_cat),
                      resident(w4_bd), resident(b4_cat)],
            out_specs=pl.BlockSpec((TB, C), lambda i: (i, 0)),
        ),
        compiler_params=pltpu.CompilerParams(
            dimension_semantics=("parallel",)),
    )(state, action, zsa, zs,
      w1_s, w1_a, b1_cat, avg_mask,
      w2h_bd, w2zsa_cat, w2zs_cat, b2_cat,
      w3_bd, b3_cat, w4_bd, b4_cat)

    # Wrapper-side layout plumbing back to the PyTorch [C, B, 1] output.
    return jnp.transpose(out[:B])[:, :, None]


# ---------------------------------------------------------------------------
# Pure-JAX reference (matches the PyTorch module exactly)
# ---------------------------------------------------------------------------
def td7_critic_reference(state, action, zsa, zs, params):
    w1, b1, w2, b2, w3, b3, w4, b4 = params
    C = w1.shape[0]
    eps = 1e-8
    sa = jnp.concatenate([state, action], axis=-1)
    h = jnp.einsum("bj,cjk->cbk", sa, w1) + b1
    h = h / jnp.maximum(jnp.mean(jnp.abs(h), -1, keepdims=True), eps)
    zsa_r = jnp.broadcast_to(zsa, (C,) + zsa.shape)
    zs_r = jnp.broadcast_to(zs, (C,) + zs.shape)
    x = jnp.concatenate([h, zsa_r, zs_r], axis=-1)
    x = jnp.maximum(jnp.einsum("cbj,cjk->cbk", x, w2) + b2, 0.0)
    x = jnp.maximum(jnp.einsum("cbj,cjk->cbk", x, w3) + b3, 0.0)
    return jnp.einsum("cbj,cjk->cbk", x, w4) + b4


def init_params(key, state_dim, action_dim, embedding_dim, hidden_dim, critic_num):
    D0 = state_dim + action_dim
    D1 = 2 * embedding_dim + hidden_dim
    keys = jax.random.split(key, 8)
    s = 0.1
    w1 = s * jax.random.normal(keys[0], (critic_num, D0, hidden_dim), jnp.float32)
    b1 = s * jax.random.normal(keys[1], (critic_num, 1, hidden_dim), jnp.float32)
    w2 = s * jax.random.normal(keys[2], (critic_num, D1, hidden_dim), jnp.float32)
    b2 = s * jax.random.normal(keys[3], (critic_num, 1, hidden_dim), jnp.float32)
    w3 = s * jax.random.normal(keys[4], (critic_num, hidden_dim, hidden_dim), jnp.float32)
    b3 = s * jax.random.normal(keys[5], (critic_num, 1, hidden_dim), jnp.float32)
    w4 = s * jax.random.normal(keys[6], (critic_num, hidden_dim, 1), jnp.float32)
    b4 = s * jax.random.normal(keys[7], (critic_num, 1, 1), jnp.float32)
    return (w1, b1, w2, b2, w3, b3, w4, b4)


if __name__ == "__main__":
    state_dim, action_dim, embedding_dim, hidden_dim, critic_num = 16, 8, 32, 64, 2
    batch = 8

    key = jax.random.PRNGKey(0)
    k_state, k_action, k_zsa, k_zs, k_params = jax.random.split(key, 5)
    state = jax.random.normal(k_state, (batch, state_dim), jnp.float32)
    action = jax.random.normal(k_action, (batch, action_dim), jnp.float32)
    zsa = jax.random.normal(k_zsa, (batch, embedding_dim), jnp.float32)
    zs = jax.random.normal(k_zs, (batch, embedding_dim), jnp.float32)
    params = init_params(k_params, state_dim, action_dim,
                         embedding_dim, hidden_dim, critic_num)

    prepped = prepare_params(params, state_dim, embedding_dim, hidden_dim)
    fwd = jax.jit(td7_critic_forward)

    out = fwd(state, action, zsa, zs, prepped)
    out = jax.block_until_ready(out)

    ref = td7_critic_reference(state, action, zsa, zs, params)
    # Tolerances loosened from 1e-5: the approx (EUP) reciprocal in AvgL1Norm
    # plus the split-K / block-diagonal MXU accumulation order differ slightly
    # from the reference's plain divide + single contraction.
    np.testing.assert_allclose(np.asarray(out), np.asarray(ref),
                               rtol=1e-3, atol=1e-3)

    assert out.shape == (critic_num, batch, 1)
    print("KERNEL_OK")
</pallas_src>

<mosaic_0001>
module attributes {stable_mosaic.version = 11 : i64} {
  func.func @td7_critic_kernel(%arg0: i32, %arg1: memref<8x16xf32, #tpu.memory_space<vmem>>, %arg2: memref<8x8xf32, #tpu.memory_space<vmem>>, %arg3: memref<8x32xf32, #tpu.memory_space<vmem>>, %arg4: memref<8x32xf32, #tpu.memory_space<vmem>>, %arg5: memref<16x128xf32, #tpu.memory_space<vmem>>, %arg6: memref<8x128xf32, #tpu.memory_space<vmem>>, %arg7: memref<1x128xf32, #tpu.memory_space<vmem>>, %arg8: memref<128x128xf32, #tpu.memory_space<vmem>>, %arg9: memref<128x128xf32, #tpu.memory_space<vmem>>, %arg10: memref<32x128xf32, #tpu.memory_space<vmem>>, %arg11: memref<32x128xf32, #tpu.memory_space<vmem>>, %arg12: memref<1x128xf32, #tpu.memory_space<vmem>>, %arg13: memref<128x128xf32, #tpu.memory_space<vmem>>, %arg14: memref<1x128xf32, #tpu.memory_space<vmem>>, %arg15: memref<128x2xf32, #tpu.memory_space<vmem>>, %arg16: memref<1x2xf32, #tpu.memory_space<vmem>>, %arg17: memref<8x2xf32, #tpu.memory_space<vmem>>) attributes {dimension_semantics = [#tpu.dimension_semantics<parallel>], iteration_bounds = array<i64: 1>, scalar_prefetch = 0 : i64, scratch_operands = 0 : i64, tpu.core_type = #tpu.core_type<tc>, window_params = [{transform_indices = @transform_0, window_bounds = array<i64: 8, 16>}, {transform_indices = @transform_1, window_bounds = array<i64: 8, 8>}, {transform_indices = @transform_2, window_bounds = array<i64: 8, 32>}, {transform_indices = @transform_3, window_bounds = array<i64: 8, 32>}, {pipeline_mode = #tpu.pipeline_mode<synchronous>, transform_indices = @transform_4, window_bounds = array<i64: 16, 128>}, {pipeline_mode = #tpu.pipeline_mode<synchronous>, transform_indices = @transform_5, window_bounds = array<i64: 8, 128>}, {pipeline_mode = #tpu.pipeline_mode<synchronous>, transform_indices = @transform_6, window_bounds = array<i64: 1, 128>}, {pipeline_mode = #tpu.pipeline_mode<synchronous>, transform_indices = @transform_7, window_bounds = array<i64: 128, 128>}, {pipeline_mode = #tpu.pipeline_mode<synchronous>, transform_indices = @transform_8, window_bounds = array<i64: 128, 128>}, {pipeline_mode = #tpu.pipeline_mode<synchronous>, transform_indices = @transform_9, window_bounds = array<i64: 32, 128>}, {pipeline_mode = #tpu.pipeline_mode<synchronous>, transform_indices = @transform_10, window_bounds = array<i64: 32, 128>}, {pipeline_mode = #tpu.pipeline_mode<synchronous>, transform_indices = @transform_11, window_bounds = array<i64: 1, 128>}, {pipeline_mode = #tpu.pipeline_mode<synchronous>, transform_indices = @transform_12, window_bounds = array<i64: 128, 128>}, {pipeline_mode = #tpu.pipeline_mode<synchronous>, transform_indices = @transform_13, window_bounds = array<i64: 1, 128>}, {pipeline_mode = #tpu.pipeline_mode<synchronous>, transform_indices = @transform_14, window_bounds = array<i64: 128, 2>}, {pipeline_mode = #tpu.pipeline_mode<synchronous>, transform_indices = @transform_15, window_bounds = array<i64: 1, 2>}, {transform_indices = @transform_16, window_bounds = array<i64: 8, 2>}]} {
    %c0 = arith.constant 0 : index
    %c0_0 = arith.constant 0 : index
    %0 = vector.load %arg1[%c0, %c0_0] : memref<8x16xf32, #tpu.memory_space<vmem>>, vector<8x16xf32>
    %c0_1 = arith.constant 0 : index
    %c0_2 = arith.constant 0 : index
    %1 = vector.load %arg5[%c0_1, %c0_2] : memref<16x128xf32, #tpu.memory_space<vmem>>, vector<16x128xf32>
    %cst = arith.constant dense<0.000000e+00> : vector<8x128xf32>
    %2 = tpu.matmul %0, %1, %cst {dimension_numbers = #tpu.dot_dimension_numbers<[1], [0], [0], [1], [0, 0, 1, 1], [], []>} : vector<8x16xf32>, vector<16x128xf32>, vector<8x128xf32> -> vector<8x128xf32>
    %c0_3 = arith.constant 0 : index
    %c0_4 = arith.constant 0 : index
    %3 = vector.load %arg2[%c0_3, %c0_4] : memref<8x8xf32, #tpu.memory_space<vmem>>, vector<8x8xf32>
    %c0_5 = arith.constant 0 : index
    %c0_6 = arith.constant 0 : index
    %4 = vector.load %arg6[%c0_5, %c0_6] : memref<8x128xf32, #tpu.memory_space<vmem>>, vector<8x128xf32>
    %cst_7 = arith.constant dense<0.000000e+00> : vector<8x128xf32>
    %5 = tpu.matmul %3, %4, %cst_7 {dimension_numbers = #tpu.dot_dimension_numbers<[1], [0], [0], [1], [0, 0, 1, 1], [], []>} : vector<8x8xf32>, vector<8x128xf32>, vector<8x128xf32> -> vector<8x128xf32>
    %6 = arith.addf %2, %5 : vector<8x128xf32>
    %c0_8 = arith.constant 0 : index
    %c0_9 = arith.constant 0 : index
    %7 = vector.load %arg7[%c0_8, %c0_9] : memref<1x128xf32, #tpu.memory_space<vmem>>, vector<1x128xf32>
    %8 = vector.broadcast %7 : vector<1x128xf32> to vector<8x128xf32>
    %9 = arith.addf %6, %8 : vector<8x128xf32>
    %10 = math.absf %9 : vector<8x128xf32>
    %c0_10 = arith.constant 0 : index
    %c0_11 = arith.constant 0 : index
    %11 = vector.load %arg8[%c0_10, %c0_11] : memref<128x128xf32, #tpu.memory_space<vmem>>, vector<128x128xf32>
    %cst_12 = arith.constant dense<0.000000e+00> : vector<8x128xf32>
    %12 = tpu.matmul %10, %11, %cst_12 {dimension_numbers = #tpu.dot_dimension_numbers<[1], [0], [0], [1], [0, 0, 1, 1], [], []>} : vector<8x128xf32>, vector<128x128xf32>, vector<8x128xf32> -> vector<8x128xf32>
    %cst_13 = arith.constant 9.99999993E-9 : f32
    %13 = vector.broadcast %cst_13 : f32 to vector<8x128xf32>
    %14 = arith.maximumf %12, %13 : vector<8x128xf32>
    %15 = tpu.reciprocal %14 {approx = true} : vector<8x128xf32> -> vector<8x128xf32>
    %16 = arith.mulf %9, %15 : vector<8x128xf32>
    %c0_14 = arith.constant 0 : index
    %c0_15 = arith.constant 0 : index
    %17 = vector.load %arg9[%c0_14, %c0_15] : memref<128x128xf32, #tpu.memory_space<vmem>>, vector<128x128xf32>
    %cst_16 = arith.constant dense<0.000000e+00> : vector<8x128xf32>
    %18 = tpu.matmul %16, %17, %cst_16 {dimension_numbers = #tpu.dot_dimension_numbers<[1], [0], [0], [1], [0, 0, 1, 1], [], []>} : vector<8x128xf32>, vector<128x128xf32>, vector<8x128xf32> -> vector<8x128xf32>
    %c0_17 = arith.constant 0 : index
    %c0_18 = arith.constant 0 : index
    %19 = vector.load %arg3[%c0_17, %c0_18] : memref<8x32xf32, #tpu.memory_space<vmem>>, vector<8x32xf32>
    %c0_19 = arith.constant 0 : index
    %c0_20 = arith.constant 0 : index
    %20 = vector.load %arg10[%c0_19, %c0_20] : memref<32x128xf32, #tpu.memory_space<vmem>>, vector<32x128xf32>
    %cst_21 = arith.constant dense<0.000000e+00> : vector<8x128xf32>
    %21 = tpu.matmul %19, %20, %cst_21 {dimension_numbers = #tpu.dot_dimension_numbers<[1], [0], [0], [1], [0, 0, 1, 1], [], []>} : vector<8x32xf32>, vector<32x128xf32>, vector<8x128xf32> -> vector<8x128xf32>
    %22 = arith.addf %18, %21 : vector<8x128xf32>
    %c0_22 = arith.constant 0 : index
    %c0_23 = arith.constant 0 : index
    %23 = vector.load %arg4[%c0_22, %c0_23] : memref<8x32xf32, #tpu.memory_space<vmem>>, vector<8x32xf32>
    %c0_24 = arith.constant 0 : index
    %c0_25 = arith.constant 0 : index
    %24 = vector.load %arg11[%c0_24, %c0_25] : memref<32x128xf32, #tpu.memory_space<vmem>>, vector<32x128xf32>
    %cst_26 = arith.constant dense<0.000000e+00> : vector<8x128xf32>
    %25 = tpu.matmul %23, %24, %cst_26 {dimension_numbers = #tpu.dot_dimension_numbers<[1], [0], [0], [1], [0, 0, 1, 1], [], []>} : vector<8x32xf32>, vector<32x128xf32>, vector<8x128xf32> -> vector<8x128xf32>
    %26 = arith.addf %22, %25 : vector<8x128xf32>
    %c0_27 = arith.constant 0 : index
    %c0_28 = arith.constant 0 : index
    %27 = vector.load %arg12[%c0_27, %c0_28] : memref<1x128xf32, #tpu.memory_space<vmem>>, vector<1x128xf32>
    %28 = vector.broadcast %27 : vector<1x128xf32> to vector<8x128xf32>
    %29 = arith.addf %26, %28 : vector<8x128xf32>
    %cst_29 = arith.constant 0.000000e+00 : f32
    %30 = vector.broadcast %cst_29 : f32 to vector<8x128xf32>
    %31 = arith.maximumf %29, %30 : vector<8x128xf32>
    %c0_30 = arith.constant 0 : index
    %c0_31 = arith.constant 0 : index
    %32 = vector.load %arg13[%c0_30, %c0_31] : memref<128x128xf32, #tpu.memory_space<vmem>>, vector<128x128xf32>
    %cst_32 = arith.constant dense<0.000000e+00> : vector<8x128xf32>
    %33 = tpu.matmul %31, %32, %cst_32 {dimension_numbers = #tpu.dot_dimension_numbers<[1], [0], [0], [1], [0, 0, 1, 1], [], []>} : vector<8x128xf32>, vector<128x128xf32>, vector<8x128xf32> -> vector<8x128xf32>
    %c0_33 = arith.constant 0 : index
    %c0_34 = arith.constant 0 : index
    %34 = vector.load %arg14[%c0_33, %c0_34] : memref<1x128xf32, #tpu.memory_space<vmem>>, vector<1x128xf32>
    %35 = vector.broadcast %34 : vector<1x128xf32> to vector<8x128xf32>
    %36 = arith.addf %33, %35 : vector<8x128xf32>
    %cst_35 = arith.constant 0.000000e+00 : f32
    %37 = vector.broadcast %cst_35 : f32 to vector<8x128xf32>
    %38 = arith.maximumf %36, %37 : vector<8x128xf32>
    %c0_36 = arith.constant 0 : index
    %c0_37 = arith.constant 0 : index
    %39 = vector.load %arg15[%c0_36, %c0_37] : memref<128x2xf32, #tpu.memory_space<vmem>>, vector<128x2xf32>
    %cst_38 = arith.constant dense<0.000000e+00> : vector<8x2xf32>
    %40 = tpu.matmul %38, %39, %cst_38 {dimension_numbers = #tpu.dot_dimension_numbers<[1], [0], [0], [1], [0, 0, 1, 1], [], []>} : vector<8x128xf32>, vector<128x2xf32>, vector<8x2xf32> -> vector<8x2xf32>
    %c0_39 = arith.constant 0 : index
    %c0_40 = arith.constant 0 : index
    %41 = vector.load %arg16[%c0_39, %c0_40] : memref<1x2xf32, #tpu.memory_space<vmem>>, vector<1x2xf32>
    %42 = vector.broadcast %41 : vector<1x2xf32> to vector<8x2xf32>
    %43 = arith.addf %40, %42 : vector<8x2xf32>
    %c0_41 = arith.constant 0 : index
    %c0_42 = arith.constant 0 : index
    %44 = vector.load %arg17[%c0_41, %c0_42] : memref<8x2xf32, #tpu.memory_space<vmem>>, vector<8x2xf32>
    tpu.vector_store %arg17[%c0_41, %c0_42], %43 {strides = array<i32>} : memref<8x2xf32, #tpu.memory_space<vmem>>, vector<8x2xf32>,
    return
  }
  func.func @transform_0(%arg0: i32) -> (i32, i32) {
    %c0_i32 = arith.constant 0 : i32
    %c0_i32_0 = arith.constant 0 : i32
    return %arg0, %c0_i32 : i32, i32
  }
  func.func @transform_1(%arg0: i32) -> (i32, i32) {
    %c0_i32 = arith.constant 0 : i32
    %c0_i32_0 = arith.constant 0 : i32
    return %arg0, %c0_i32 : i32, i32
  }
  func.func @transform_2(%arg0: i32) -> (i32, i32) {
    %c0_i32 = arith.constant 0 : i32
    %c0_i32_0 = arith.constant 0 : i32
    return %arg0, %c0_i32 : i32, i32
  }
  func.func @transform_3(%arg0: i32) -> (i32, i32) {
    %c0_i32 = arith.constant 0 : i32
    %c0_i32_0 = arith.constant 0 : i32
    return %arg0, %c0_i32 : i32, i32
  }
  func.func @transform_4(%arg0: i32) -> (i32, i32) {
    %c0_i32 = arith.constant 0 : i32
    %c0_i32_0 = arith.constant 0 : i32
    %c0_i32_1 = arith.constant 0 : i32
    return %c0_i32, %c0_i32_0 : i32, i32
  }
  func.func @transform_5(%arg0: i32) -> (i32, i32) {
    %c0_i32 = arith.constant 0 : i32
    %c0_i32_0 = arith.constant 0 : i32
    %c0_i32_1 = arith.constant 0 : i32
    return %c0_i32, %c0_i32_0 : i32, i32
  }
  func.func @transform_6(%arg0: i32) -> (i32, i32) {
    %c0_i32 = arith.constant 0 : i32
    %c0_i32_0 = arith.constant 0 : i32
    %c0_i32_1 = arith.constant 0 : i32
    return %c0_i32, %c0_i32_0 : i32, i32
  }
  func.func @transform_7(%arg0: i32) -> (i32, i32) {
    %c0_i32 = arith.constant 0 : i32
    %c0_i32_0 = arith.constant 0 : i32
    %c0_i32_1 = arith.constant 0 : i32
    return %c0_i32, %c0_i32_0 : i32, i32
  }
  func.func @transform_8(%arg0: i32) -> (i32, i32) {
    %c0_i32 = arith.constant 0 : i32
    %c0_i32_0 = arith.constant 0 : i32
    %c0_i32_1 = arith.constant 0 : i32
    return %c0_i32, %c0_i32_0 : i32, i32
  }
  func.func @transform_9(%arg0: i32) -> (i32, i32) {
    %c0_i32 = arith.constant 0 : i32
    %c0_i32_0 = arith.constant 0 : i32
    %c0_i32_1 = arith.constant 0 : i32
    return %c0_i32, %c0_i32_0 : i32, i32
  }
  func.func @transform_10(%arg0: i32) -> (i32, i32) {
    %c0_i32 = arith.constant 0 : i32
    %c0_i32_0 = arith.constant 0 : i32
    %c0_i32_1 = arith.constant 0 : i32
    return %c0_i32, %c0_i32_0 : i32, i32
  }
  func.func @transform_11(%arg0: i32) -> (i32, i32) {
    %c0_i32 = arith.constant 0 : i32
    %c0_i32_0 = arith.constant 0 : i32
    %c0_i32_1 = arith.constant 0 : i32
    return %c0_i32, %c0_i32_0 : i32, i32
  }
  func.func @transform_12(%arg0: i32) -> (i32, i32) {
    %c0_i32 = arith.constant 0 : i32
    %c0_i32_0 = arith.constant 0 : i32
    %c0_i32_1 = arith.constant 0 : i32
    return %c0_i32, %c0_i32_0 : i32, i32
  }
  func.func @transform_13(%arg0: i32) -> (i32, i32) {
    %c0_i32 = arith.constant 0 : i32
    %c0_i32_0 = arith.constant 0 : i32
    %c0_i32_1 = arith.constant 0 : i32
    return %c0_i32, %c0_i32_0 : i32, i32
  }
  func.func @transform_14(%arg0: i32) -> (i32, i32) {
    %c0_i32 = arith.constant 0 : i32
    %c0_i32_0 = arith.constant 0 : i32
    %c0_i32_1 = arith.constant 0 : i32
    return %c0_i32, %c0_i32_0 : i32, i32
  }
  func.func @transform_15(%arg0: i32) -> (i32, i32) {
    %c0_i32 = arith.constant 0 : i32
    %c0_i32_0 = arith.constant 0 : i32
    %c0_i32_1 = arith.constant 0 : i32
    return %c0_i32, %c0_i32_0 : i32, i32
  }
  func.func @transform_16(%arg0: i32) -> (i32, i32) {
    %c0_i32 = arith.constant 0 : i32
    %c0_i32_0 = arith.constant 0 : i32
    return %arg0, %c0_i32 : i32, i32
  }
}

</mosaic_0001>

<bundles_post_ra>
// kernel: td7_critic_forward.1
= control target key start
LH: loop header
LB: loop body
LE: loop exit
PB: predicated region body
PF: predicated region fallthrough
CT: control target
= control target key end

     0   :  { %s1693_s0 = inlined_call_operand.vmem [shape: f32[8,16], index: 0, kind: input, shape index: {}]   ;;  %s1694_s1 = inlined_call_operand.hbm [shape: f32[8,8], index: 1, kind: input, shape index: {}]   ;;  %s1695_s2 = inlined_call_operand.hbm [shape: f32[8,32], index: 2, kind: input, shape index: {}]   ;;  %s1696_s3 = inlined_call_operand.hbm [shape: f32[8,32], index: 3, kind: input, shape index: {}]   ;;  %s1697_s4 = inlined_call_operand.hbm [shape: f32[16,128], index: 4, kind: input, shape index: {}]   ;;  %s1698_s5 = inlined_call_operand.hbm [shape: f32[8,128], index: 5, kind: input, shape index: {}]   ;;  %s1699_s6 = inlined_call_operand.vmem [shape: f32[1,128], index: 6, kind: input, shape index: {}]   ;;  %s1700_s7 = inlined_call_operand.vmem [shape: f32[128,128], index: 7, kind: input, shape index: {}]   ;;  %s1701_s8 = inlined_call_operand.hbm [shape: f32[128,128], index: 8, kind: input, shape index: {}]   ;;  %s1702_s9 = inlined_call_operand.hbm [shape: f32[32,128], index: 9, kind: input, shape index: {}]   ;;  %s1703_s10 = inlined_call_operand.hbm [shape: f32[32,128], index: 10, kind: input, shape index: {}]   ;;  %s1704_s11 = inlined_call_operand.vmem [shape: f32[1,128], index: 11, kind: input, shape index: {}]   ;;  %s1705_s12 = inlined_call_operand.hbm [shape: f32[128,128], index: 12, kind: input, shape index: {}]   ;;  %s1706_s13 = inlined_call_operand.vmem [shape: f32[1,128], index: 13, kind: input, shape index: {}]   ;;  %s1707_s14 = inlined_call_operand.vmem [shape: f32[128,2], index: 14, kind: input, shape index: {}]   ;;  %s1708_s15 = inlined_call_operand.vmem [shape: f32[1,2], index: 15, kind: input, shape index: {}]   ;;  %s1709_s16 = inlined_call_operand.vmem [shape: f32[8,2], index: 16, kind: output, shape index: {}]  }
   0x1   :  { %1710 = sst [smem:[#allocation21_spill]] %s1693_s0 }
   0x2   :  { %21 = vsyncpa [#allocation3], 0 }
   0x3   :  { %22 = vsyncpa [#allocation5], 0 }
   0x4   :  { %23 = vsyncpa [#allocation8], 0 }
   0x5   :  { %24 = vsyncpa [#allocation11], 0 }
   0x6   :  { %25 = vsyncpa [#allocation14], 0  ;;  %s1339_s21 = smov [#allocation4]   ;;  %s1340_s23 = smov [#allocation7]  }
   0x7   :  { %s44_s22 = sshll.u32 %s1339_s21, 4  ;;  %s63_s24 = sshll.u32 %s1340_s23, 4  ;;  %s45_s22 = int_to_ptr.vmem [resolvable:$true] %s44_s22  ;;  %s64_s24 = int_to_ptr.vmem [resolvable:$true] %s63_s24 }
   0x8   :  { %s1157_s25 = scalar_lea.vmem %s45_s22, 128  ;;  %p1162_p1 = scmp.lt.s32.totalorder %s45_s22, %s45_s22 }
   0x9   :  { %p1158_p0 = scmp.ne.s32.totalorder %s45_s22, %s1157_s25  ;;  %p1163_p2 = scmp.lt.s32.totalorder %s1157_s25, %s1157_s25 }
   0xb   :  { %p1164_p3 = por %p1163_p2, %p1162_p1 }
   0xd   :  { %p1165_p4 = pnand %p1164_p3, %p1158_p0 }
   0xf   :  { %1168 = shalt.err (!%p1165_p4)
}
  0x10   :  { %47 = dma.hbm_to_vmem [thread:$0]  %s1695_s2, 128, %s45_s22, [#allocation5]  }
  0x11   :  { %s1177_s28 = scalar_lea.vmem %s64_s24, 256  ;;  %p1182_p6 = scmp.lt.s32.totalorder %s64_s24, %s64_s24 }
  0x12   :  { %p1178_p5 = scmp.ne.s32.totalorder %s64_s24, %s1177_s28  ;;  %p1183_p7 = scmp.lt.s32.totalorder %s1177_s28, %s1177_s28 }
  0x14   :  { %p1184_p8 = por %p1183_p7, %p1182_p6 }
  0x16   :  { %p1185_p9 = pnand %p1184_p8, %p1178_p5 }
  0x18   :  { %1188 = shalt.err (!%p1185_p9)
}
  0x19   :  { %s1341_s29 = smov 128   ;;  %s1342_s30 = smov 8  }
  0x1a   :  { %69 = dma.hbm_to_vmem [thread:$0]  %s1697_s4, 256, %s64_s24, [#allocation8], %s1341_s29, %s1341_s29, %s1342_s30  }
  0x1b   :  { %s1343_s18 = smov [#allocation10]   ;;  %s1344_s20 = smov [#allocation13]  }
  0x1c   :  { %s89_s19 = sshll.u32 %s1343_s18, 4  ;;  %s113_s2 = sshll.u32 %s1344_s20, 4  ;;  %s90_s19 = int_to_ptr.vmem [resolvable:$true] %s89_s19  ;;  %s114_s2 = int_to_ptr.vmem [resolvable:$true] %s113_s2 }
  0x1d   :  { %s1197_s21 = scalar_lea.vmem %s90_s19, 2048  ;;  %p1202_p11 = scmp.lt.s32.totalorder %s90_s19, %s90_s19 }
  0x1e   :  { %p1198_p10 = scmp.ne.s32.totalorder %s90_s19, %s1197_s21  ;;  %p1203_p12 = scmp.lt.s32.totalorder %s1197_s21, %s1197_s21 }
  0x20   :  { %p1204_p13 = por %p1203_p12, %p1202_p11 }
  0x22   :  { %p1205_p0 = pnand %p1204_p13, %p1198_p10 }
  0x24   :  { %1208 = shalt.err (!%p1205_p0)
}
  0x25   :  { %95 = dma.hbm_to_vmem [thread:$0]  %s1701_s8, 2048, %s90_s19, [#allocation11], %s1341_s29, %s1341_s29, %s1342_s30  }
  0x26   :  { %s1217_s4 = scalar_lea.vmem %s114_s2, 512  ;;  %p1222_p2 = scmp.lt.s32.totalorder %s114_s2, %s114_s2 }
  0x27   :  { %p1218_p1 = scmp.ne.s32.totalorder %s114_s2, %s1217_s4  ;;  %p1223_p3 = scmp.lt.s32.totalorder %s1217_s4, %s1217_s4 }
  0x29   :  { %p1224_p4 = por %p1223_p3, %p1222_p2 }
  0x2b   :  { %p1225_p5 = pnand %p1224_p4, %p1218_p1 }
  0x2d   :  { %1228 = shalt.err (!%p1225_p5)
}
  0x2e   :  { %119 = dma.hbm_to_vmem [thread:$0]  %s1703_s10, 512, %s114_s2, [#allocation14], %s1341_s29, %s1341_s29, %s1342_s30  }
  0x2f   :  { %s1345_s26 = smov [#allocation2]   ;;  %s1346_s28 = smov [#allocation6]  }
  0x30   :  { %s34_s27 = sshll.u32 %s1345_s26, 4  ;;  %s54_s0 = sshll.u32 %s1346_s28, 4  ;;  %s35_s27 = int_to_ptr.vmem [resolvable:$true] %s34_s27  ;;  %s55_s0 = int_to_ptr.vmem [resolvable:$true] %s54_s0 }
  0x31   :  { %s1237_s8 = scalar_lea.vmem %s35_s27, 128  ;;  %p1242_p7 = scmp.lt.s32.totalorder %s35_s27, %s35_s27 }
  0x32   :  { %p1238_p6 = scmp.ne.s32.totalorder %s35_s27, %s1237_s8  ;;  %p1243_p8 = scmp.lt.s32.totalorder %s1237_s8, %s1237_s8 }
  0x34   :  { %p1244_p9 = por %p1243_p8, %p1242_p7 }
  0x36   :  { %p1245_p10 = pnand %p1244_p9, %p1238_p6 }
  0x38   :  { %1248 = shalt.err (!%p1245_p10)
}
  0x39   :  { %37 = dma.hbm_to_vmem [thread:$0]  %s1694_s1, 128, %s35_s27, [#allocation3]  }
  0x3a   :  { %s1257_s19 = scalar_lea.vmem %s55_s0, 128  ;;  %p1262_p12 = scmp.lt.s32.totalorder %s55_s0, %s55_s0 }
  0x3b   :  { %p1258_p11 = scmp.ne.s32.totalorder %s55_s0, %s1257_s19  ;;  %p1263_p13 = scmp.lt.s32.totalorder %s1257_s19, %s1257_s19 }
  0x3d   :  { %p1264_p0 = por %p1263_p13, %p1262_p12 }
  0x3f   :  { %p1265_p1 = pnand %p1264_p0, %p1258_p11 }
  0x41   :  { %1268 = shalt.err (!%p1265_p1)
}
  0x42   :  { %57 = dma.hbm_to_vmem [thread:$0]  %s1696_s3, 128, %s55_s0, [#allocation5]  }
  0x43   :  { %s1347_s2 = smov [#allocation9]   ;;  %s1348_s22 = smov [#allocation12]  }
  0x44   :  { %s76_s21 = sshll.u32 %s1347_s2, 4  ;;  %s101_s23 = sshll.u32 %s1348_s22, 4  ;;  %s77_s21 = int_to_ptr.vmem [resolvable:$true] %s76_s21  ;;  %s102_s23 = int_to_ptr.vmem [resolvable:$true] %s101_s23 }
  0x45   :  { %s1277_s4 = scalar_lea.vmem %s77_s21, 128  ;;  %p1282_p3 = scmp.lt.s32.totalorder %s77_s21, %s77_s21 }
  0x46   :  { %p1278_p2 = scmp.ne.s32.totalorder %s77_s21, %s1277_s4  ;;  %p1283_p4 = scmp.lt.s32.totalorder %s1277_s4, %s1277_s4 }
  0x48   :  { %p1284_p5 = por %p1283_p4, %p1282_p3 }
  0x4a   :  { %p1285_p6 = pnand %p1284_p5, %p1278_p2 }
  0x4c   :  { %1288 = shalt.err (!%p1285_p6)
}
  0x4d   :  { %79 = dma.hbm_to_vmem [thread:$0]  %s1698_s5, 128, %s77_s21, [#allocation8]  }
  0x4e   :  { %s1297_s25 = scalar_lea.vmem %s102_s23, 512  ;;  %p1302_p8 = scmp.lt.s32.totalorder %s102_s23, %s102_s23 }
  0x4f   :  { %p1298_p7 = scmp.ne.s32.totalorder %s102_s23, %s1297_s25  ;;  %p1303_p9 = scmp.lt.s32.totalorder %s1297_s25, %s1297_s25 }
  0x51   :  { %p1304_p10 = por %p1303_p9, %p1302_p8 }
  0x53   :  { %p1305_p11 = pnand %p1304_p10, %p1298_p7 }
  0x55   :  { %1308 = shalt.err (!%p1305_p11)
}
  0x56   :  { %107 = dma.hbm_to_vmem [thread:$0]  %s1702_s9, 512, %s102_s23, [#allocation11], %s1341_s29, %s1341_s29, %s1342_s30  }
  0x57   :  { %s1349_s27 = smov [#allocation15]  }
  0x58   :  { %s127_s28 = sshll.u32 %s1349_s27, 4  ;;  %s128_s28 = int_to_ptr.vmem [resolvable:$true] %s127_s28 }
  0x59   :  { %s1317_s0 = scalar_lea.vmem %s128_s28, 2048  ;;  %p1322_p13 = scmp.lt.s32.totalorder %s128_s28, %s128_s28 }
  0x5a   :  { %p1318_p12 = scmp.ne.s32.totalorder %s128_s28, %s1317_s0  ;;  %p1323_p0 = scmp.lt.s32.totalorder %s1317_s0, %s1317_s0 }
  0x5c   :  { %p1324_p1 = por %p1323_p0, %p1322_p13 }
  0x5e   :  { %p1325_p2 = pnand %p1324_p1, %p1318_p12 }
  0x60   :  { %1328 = shalt.err (!%p1325_p2)
}
  0x61   :  { %133 = dma.hbm_to_vmem [thread:$0]  %s1705_s12, 2048, %s128_s28, [#allocation14], %s1341_s29, %s1341_s29, %s1342_s30  }
  0x62   :  { %1329 = dma.done.wait [#allocation3], 128  }
  0x63   :  { %1330 = vsyncadd [#allocation3], 4294967168 }
  0x64   :  { %1331 = dma.done.wait [#allocation5], 256  }
  0x65   :  { %1332 = vsyncadd [#allocation5], 4294967040 }
  0x66   :  { %1333 = dma.done.wait [#allocation8], 384  }
  0x67   :  { %1334 = vsyncadd [#allocation8], 4294966912 }
  0x68   :  { %1335 = dma.done.wait [#allocation11], 2560  }
  0x69   :  { %1336 = vsyncadd [#allocation11], 4294964736 }
  0x6a   :  { %1337 = dma.done.wait [#allocation14], 2560  }
  0x6b   :  { %1338 = vsyncadd [#allocation14], 4294964736  ;;  %v1350_v0 = vmov 0.0   ;;  %vm1351_vm0 = vmmov 0   ;;  %vm172_vm1 = vcmask 64512   ;;  %v171_v1 = vld [vmem:[#allocation9] sm:$0xff] }
  0x6c   :  { %960 = vmatprep.subr.mxu0 %v1350_v0  ;;  %965 = vmatprep.subr.mxu1 %v1350_v0  ;;  %v169_v2 = vld [vmem:[#allocation7 + $0x8] sm:$0xff]  ;;  %v168_v4 = vld [vmem:[#allocation7] sm:$0xff]  ;;  %s1711_s29 = sld [smem:[#allocation21_spill]]  ;;  %vm246_vm2 = vcmask 130048   ;;  %v343_v7 = vld [vmem:[%s1700_s7 + $0x70] sm:$0xff]  ;;  %vm439_vm3 = vcmask 261120  }
  0x6d   :  { %962 = vmatprep.mubr.msk.f32.mxu0 %vm1351_vm0, %v1350_v0  ;;  %969 = vmatprep.mubr.msk.f32.mxu1 %vm1351_vm0, %v1350_v0  ;;  %v170_v3 = vld [vmem:[#allocation2] sm:$0xff]  ;;  %v344_v6 = vld [vmem:[%s1700_s7 + $0x78] sm:$0xff]  ;;  %v342_v8 = vld [vmem:[%s1700_s7 + $0x68] sm:$0xff]  ;;  %vm858_vm4 = vcmask 15360  }
  0x6e   :  { %961 = vmatpush3.msra.mxu0 %v171_v1  ;;  %966 = vmatpush3.msra.mxu1 %v169_v2  ;;  %v341_v9 = vld [vmem:[%s1700_s7 + $0x60] sm:$0xff]  ;;  %v340_v10 = vld [vmem:[%s1700_s7 + $0x58] sm:$0xff]  ;;  %v339_v11 = vld [vmem:[%s1700_s7 + $0x50] sm:$0xff] }
  0x6f   :  { %963 = vmatmul.mubr.msk.f32.vlgmr.msra.gmra.mxu0 %vm172_vm1, %v170_v3  ;;  %967 = vmatprep.subr.mxu1 %v1350_v0  ;;  %v338_v12 = vld [vmem:[%s1700_s7 + $0x48] sm:$0xff]  ;;  %v337_v13 = vld [vmem:[%s1700_s7 + $0x40] sm:$0xff]  ;;  %v336_v14 = vld [vmem:[%s1700_s7 + $0x38] sm:$0xff] }
  0x70   :  { %968 = vmatpush3.msra.mxu1 %v168_v4  ;;  %972 = vmatprep.subr.mxu0 %v1350_v0  ;;  %v335_v15 = vld [vmem:[%s1700_s7 + $0x30] sm:$0xff]  ;;  %v334_v16 = vld [vmem:[%s1700_s7 + $0x28] sm:$0xff]  ;;  %v333_v17 = vld [vmem:[%s1700_s7 + $0x20] sm:$0xff] }
  0x71   :  { %973 = vmatpush3.msra.mxu0 %v344_v6  ;;  %1004 = vmatprep.mubr.msk.f32.mxu0 %vm1351_vm0, %v1350_v0  ;;  %v332_v18 = vld [vmem:[%s1700_s7 + $0x18] sm:$0xff]  ;;  %v331_v19 = vld [vmem:[%s1700_s7 + $0x10] sm:$0xff]  ;;  %v330_v20 = vld [vmem:[%s1700_s7 + $0x8] sm:$0xff] }
  0x72   :  { %v167_v5 = vld [vmem:[%s1711_s29] sm:$0xff]  ;;  %974 = vmatprep.subr.mxu0 %v1350_v0  ;;  %1007 = vmatprep.subr.mxu1 %v1350_v0  ;;  %v438_v22 = vld [vmem:[#allocation12 + $0x18] sm:$0xff]  ;;  %v436_v24 = vld [vmem:[#allocation12 + $0x8] sm:$0xff] }
  0x73   :  { %970 = vmatmul.mubr.msk.f32.vlgmr.msra.gmra.mxu1 %vm246_vm2, %v167_v5  ;;  %975 = vmatpush3.msra.mxu0 %v343_v7  ;;  %v329_v21 = vld [vmem:[%s1700_s7] sm:$0xff]  ;;  %v435_v25 = vld [vmem:[#allocation12] sm:$0xff]  ;;  %v434_v26 = vld [vmem:[#allocation4] sm:$0xff] }
  0x74   :  { %976 = vmatprep.subr.mxu0 %v1350_v0  ;;  %1015 = vmatprep.mubr.msk.f32.mxu1 %vm1351_vm0, %v1350_v0  ;;  %v437_v23 = vld [vmem:[#allocation12 + $0x10] sm:$0xff]  ;;  %v433_v27 = vld [vmem:[#allocation10 + $0x78] sm:$0xff]  ;;  %v431_v29 = vld [vmem:[#allocation10 + $0x68] sm:$0xff] }
  0x75   :  { %977 = vmatpush3.msra.mxu0 %v342_v8  ;;  %1008 = vmatpush3.msra.mxu1 %v438_v22  ;;  %v432_v28 = vld [vmem:[#allocation10 + $0x70] sm:$0xff]  ;;  %v430_v30 = vld [vmem:[#allocation10 + $0x60] sm:$0xff]  ;;  %v429_v31 = vld [vmem:[#allocation10 + $0x58] sm:$0xff] }
  0x76   :  { %978 = vmatprep.subr.mxu0 %v1350_v0  ;;  %1009 = vmatprep.subr.mxu1 %v1350_v0  ;;  %v428_v32 = vld [vmem:[#allocation10 + $0x50] sm:$0xff]  ;;  %v427_v41 = vld [vmem:[#allocation10 + $0x48] sm:$0xff]  ;;  %v426_v42 = vld [vmem:[#allocation10 + $0x40] sm:$0xff] }
  0x77   :  { %979 = vmatpush3.msra.mxu0 %v341_v9  ;;  %1010 = vmatpush3.msra.mxu1 %v437_v23  ;;  %v871_v36 = vld [vmem:[%s1699_s6] ss:$0 sm:$0xff]  ;;  %v425_v43 = vld [vmem:[#allocation10 + $0x38] sm:$0xff]  ;;  %v423_v46 = vld [vmem:[#allocation10 + $0x28] sm:$0xff] }
  0x78   :  { %980 = vmatprep.subr.mxu0 %v1350_v0  ;;  %1011 = vmatprep.subr.mxu1 %v1350_v0  ;;  %v424_v44 = vld [vmem:[#allocation10 + $0x30] sm:$0xff]  ;;  %v587_v45 = vld [vmem:[#allocation13 + $0x18] sm:$0xff]  ;;  %v585_v48 = vld [vmem:[#allocation13 + $0x8] sm:$0xff] }
  0x79   :  { %981 = vmatpush3.msra.mxu0 %v340_v10  ;;  %1012 = vmatpush3.msra.mxu1 %v436_v24  ;;  %v586_v47 = vld [vmem:[#allocation13 + $0x10] sm:$0xff]  ;;  %v422_v49 = vld [vmem:[#allocation10 + $0x20] sm:$0xff]  ;;  %v421_v51 = vld [vmem:[#allocation10 + $0x18] sm:$0xff] }
  0x7a   :  { %982 = vmatprep.subr.mxu0 %v1350_v0  ;;  %1013 = vmatprep.subr.mxu1 %v1350_v0  ;;  %v584_v50 = vld [vmem:[#allocation13] sm:$0xff]  ;;  %v420_v52 = vld [vmem:[#allocation10 + $0x10] sm:$0xff]  ;;  %v419_v53 = vld [vmem:[#allocation10 + $0x8] sm:$0xff] }
  0x7b   :  { %983 = vmatpush3.msra.mxu0 %v339_v11  ;;  %1014 = vmatpush3.msra.mxu1 %v435_v25  ;;  %v418_v54 = vld [vmem:[#allocation10] sm:$0xff]  ;;  %v686_v57 = vld [vmem:[#allocation15 + $0x78] sm:$0xff]  ;;  %v685_v58 = vld [vmem:[#allocation15 + $0x70] sm:$0xff] }
  0x7c   :  { %984 = vmatprep.subr.mxu0 %v1350_v0  ;;  %1016 = vmatmul.mubr.msk.f32.vlgmr.msra.gmra.mxu1 %vm439_vm3, %v434_v26  ;;  %v583_v55 = vld [vmem:[#allocation6] sm:$0xff]  ;;  %v684_v60 = vld [vmem:[#allocation15 + $0x68] sm:$0xff]  ;;  %v682_v62 = vld [vmem:[#allocation15 + $0x58] sm:$0xff] }
  0x7d   :  { %985 = vmatpush3.msra.mxu0 %v338_v12  ;;  %1018 = vmatprep.subr.mxu1 %v1350_v0  ;;  %v683_v61 = vld [vmem:[#allocation15 + $0x60] sm:$0xff]  ;;  %v681_v63 = vld [vmem:[#allocation15 + $0x50] sm:$0xff]  ;;  %v680_v1 = vld [vmem:[#allocation15 + $0x48] sm:$0xff] }
  0x7e   :  { %986 = vmatprep.subr.mxu0 %v1350_v0  ;;  %1019 = vmatpush3.msra.mxu1 %v433_v27  ;;  %v679_v2 = vld [vmem:[#allocation15 + $0x40] sm:$0xff]  ;;  %v678_v3 = vld [vmem:[#allocation15 + $0x38] sm:$0xff]  ;;  %v677_v4 = vld [vmem:[#allocation15 + $0x30] sm:$0xff] }
  0x7f   :  { %987 = vmatpush3.msra.mxu0 %v337_v13  ;;  %1050 = vmatprep.mubr.msk.f32.mxu1 %vm1351_vm0, %v1350_v0  ;;  %v676_v5 = vld [vmem:[#allocation15 + $0x28] sm:$0xff]  ;;  %v675_v11 = vld [vmem:[#allocation15 + $0x20] sm:$0xff]  ;;  %v674_v13 = vld [vmem:[#allocation15 + $0x18] sm:$0xff] }
  0x80   :  { %988 = vmatprep.subr.mxu0 %v1350_v0  ;;  %1020 = vmatprep.subr.mxu1 %v1350_v0  ;;  %v776_v22 = vld [vmem:[%s1707_s14 + $0x58] sm:$0xff]  ;;  %v775_v23 = vld [vmem:[%s1707_s14 + $0x50] sm:$0xff]  ;;  %v774_v24 = vld [vmem:[%s1707_s14 + $0x48] sm:$0xff] }
  0x81   :  { %989 = vmatpush3.msra.mxu0 %v336_v14  ;;  %1021 = vmatpush3.msra.mxu1 %v432_v28  ;;  %v773_v25 = vld [vmem:[%s1707_s14 + $0x40] sm:$0xff]  ;;  %v772_v26 = vld [vmem:[%s1707_s14 + $0x38] sm:$0xff]  ;;  %v771_v27 = vld [vmem:[%s1707_s14 + $0x30] sm:$0xff] }
  0x82   :  { %990 = vmatprep.subr.mxu0 %v1350_v0  ;;  %1022 = vmatprep.subr.mxu1 %v1350_v0  ;;  %v770_v28 = vld [vmem:[%s1707_s14 + $0x28] sm:$0xff] }
  0x83   :  { %991 = vmatpush3.msra.mxu0 %v335_v15  ;;  %1023 = vmatpush3.msra.mxu1 %v431_v29  ;;  %v673_v15 = vld [vmem:[#allocation15 + $0x10] sm:$0xff] }
  0x84   :  { %992 = vmatprep.subr.mxu0 %v1350_v0  ;;  %1024 = vmatprep.subr.mxu1 %v1350_v0  ;;  %v769_v29 = vld [vmem:[%s1707_s14 + $0x20] sm:$0xff] }
  0x85   :  { %993 = vmatpush3.msra.mxu0 %v334_v16  ;;  %1025 = vmatpush3.msra.mxu1 %v430_v30  ;;  %v672_v16 = vld [vmem:[#allocation15 + $0x8] sm:$0xff] }
  0x86   :  { %994 = vmatprep.subr.mxu0 %v1350_v0  ;;  %1026 = vmatprep.subr.mxu1 %v1350_v0  ;;  %v768_v30 = vld [vmem:[%s1707_s14 + $0x18] sm:$0xff] }
  0x87   :  { %995 = vmatpush3.msra.mxu0 %v333_v17  ;;  %1027 = vmatpush3.msra.mxu1 %v429_v31  ;;  %v671_v17 = vld [vmem:[#allocation15] sm:$0xff] }
  0x88   :  { %996 = vmatprep.subr.mxu0 %v1350_v0  ;;  %1028 = vmatprep.subr.mxu1 %v1350_v0 }
  0x89   :  { %997 = vmatpush3.msra.mxu0 %v332_v18  ;;  %1029 = vmatpush3.msra.mxu1 %v428_v32  ;;  %v780_v18 = vld [vmem:[%s1707_s14 + $0x78] sm:$0xff] }
  0x8a   :  { %998 = vmatprep.subr.mxu0 %v1350_v0  ;;  %1030 = vmatprep.subr.mxu1 %v1350_v0 }
  0x8b   :  { %999 = vmatpush3.msra.mxu0 %v331_v19  ;;  %1031 = vmatpush3.msra.mxu1 %v427_v41  ;;  %v779_v19 = vld [vmem:[%s1707_s14 + $0x70] sm:$0xff]  ;;  %v875_v41 = vld [vmem:[%s1706_s13] ss:$0 sm:$0xff] }
  0x8c   :  { %1000 = vmatprep.subr.mxu0 %v1350_v0  ;;  %1032 = vmatprep.subr.mxu1 %v1350_v0 }
  0x8d   :  { %1001 = vmatpush3.msra.mxu0 %v330_v20  ;;  %1033 = vmatpush3.msra.mxu1 %v426_v42  ;;  %v778_v20 = vld [vmem:[%s1707_s14 + $0x68] sm:$0xff] }
  0x8e   :  { %1002 = vmatprep.subr.mxu0 %v1350_v0  ;;  %1034 = vmatprep.subr.mxu1 %v1350_v0 }
  0x8f   :  { %1003 = vmatpush3.msra.mxu0 %v329_v21  ;;  %1035 = vmatpush3.msra.mxu1 %v425_v43  ;;  %v777_v21 = vld [vmem:[%s1707_s14 + $0x60] sm:$0xff] }
  0x90   :  { %1053 = vmatprep.subr.mxu0 %v1350_v0  ;;  %1036 = vmatprep.subr.mxu1 %v1350_v0 }
  0x91   :  { %1037 = vmatpush3.msra.mxu1 %v424_v44 }
  0x92   :  { %1038 = vmatprep.subr.mxu1 %v1350_v0 }
  0x93   :  { %1039 = vmatpush3.msra.mxu1 %v423_v46  ;;  %v876_v46 = vld [vmem:[%s1708_s15] ss:$0 sm:$0xff] }
  0x94   :  { %1040 = vmatprep.subr.mxu1 %v1350_v0 }
  0x95   :  { %1041 = vmatpush3.msra.mxu1 %v422_v49 }
  0x96   :  { %1042 = vmatprep.subr.mxu1 %v1350_v0 }
  0x97   :  { %1043 = vmatpush3.msra.mxu1 %v421_v51 }
  0x98   :  { %1044 = vmatprep.subr.mxu1 %v1350_v0 }
  0x99   :  { %1045 = vmatpush3.msra.mxu1 %v420_v52 }
  0x9a   :  { %1046 = vmatprep.subr.mxu1 %v1350_v0 }
  0x9b   :  { %1047 = vmatpush3.msra.mxu1 %v419_v53 }
  0x9c   :  { %1048 = vmatprep.subr.mxu1 %v1350_v0 }
  0x9d   :  { %1049 = vmatpush3.msra.mxu1 %v418_v54 }
  0x9e   :  { %1099 = vmatprep.subr.mxu1 %v1350_v0 }
 0x12f   :  { %v242_v33 = vpop.f32.mrf.mxu0 }
 0x131   :  { %v964_v34 = vpop.f32.mrf.mxu0 }
 0x133   :  { %v316_v35 = vpop.f32.mrf.mxu1 }
 0x134   :  { %v317_v37 = vadd.f32 %v316_v35, %v242_v33  ;;  %v874_v33 = vld [vmem:[%s1704_s11] ss:$0 sm:$0xff] }
 0x135   :  { %v971_v38 = vpop.f32.mrf.mxu1 }
 0x136   :  { %v1575_v39 = vadd.f32 %v871_v36, %v317_v37  ;;  %v767_v38 = vld [vmem:[%s1707_s14 + $0x10] sm:$0xff] }
 0x138   :  { %v328_v40 = vand.u32 2147483647, %v1575_v39 }
 0x13a   :  { %1005 = vmatmul.mubr.f32.vlgmr.msra.gmra.mxu0 %v328_v40  ;;  %v765_v40 = vld [vmem:[%s1707_s14] sm:$0xff] }
 0x13b   :  { %1061 = vmatprep.mubr.msk.f32.mxu0 %vm1351_vm0, %v1350_v0  ;;  %1054 = vmatpush3.msra.mxu0 %v587_v45 }
 0x13c   :  { %1055 = vmatprep.subr.mxu0 %v1350_v0  ;;  %v1594_v56 = vpop.f32.mrf.mxu1 }
 0x13d   :  { %1056 = vmatpush3.msra.mxu0 %v586_v47 }
 0x13e   :  { %1057 = vmatprep.subr.mxu0 %v1350_v0  ;;  %v1017_v59 = vpop.f32.mrf.mxu1 }
 0x13f   :  { %1058 = vmatpush3.msra.mxu0 %v585_v48 }
 0x140   :  { %1059 = vmatprep.subr.mxu0 %v1350_v0 }
 0x141   :  { %1060 = vmatpush3.msra.mxu0 %v584_v50 }
 0x142   :  { %1064 = vmatprep.subr.mxu0 %v1350_v0  ;;  %1062 = vmatmul.mubr.msk.f32.vlgmr.msra.gmra.mxu0 %vm439_vm3, %v583_v55 }
 0x143   :  { %1065 = vmatpush3.msra.mxu0 %v686_v57  ;;  %1096 = vmatprep.mubr.msk.f32.mxu0 %vm1351_vm0, %v1350_v0 }
 0x144   :  { %1066 = vmatprep.subr.mxu0 %v1350_v0 }
 0x145   :  { %1067 = vmatpush3.msra.mxu0 %v685_v58 }
 0x146   :  { %1068 = vmatprep.subr.mxu0 %v1350_v0 }
 0x147   :  { %1069 = vmatpush3.msra.mxu0 %v684_v60 }
 0x148   :  { %1070 = vmatprep.subr.mxu0 %v1350_v0 }
 0x149   :  { %1071 = vmatpush3.msra.mxu0 %v683_v61 }
 0x14a   :  { %1072 = vmatprep.subr.mxu0 %v1350_v0 }
 0x14b   :  { %1073 = vmatpush3.msra.mxu0 %v682_v62 }
 0x14c   :  { %1074 = vmatprep.subr.mxu0 %v1350_v0 }
 0x14d   :  { %1075 = vmatpush3.msra.mxu0 %v681_v63 }
 0x14e   :  { %1076 = vmatprep.subr.mxu0 %v1350_v0 }
 0x14f   :  { %1077 = vmatpush3.msra.mxu0 %v680_v1 }
 0x150   :  { %1078 = vmatprep.subr.mxu0 %v1350_v0 }
 0x151   :  { %1079 = vmatpush3.msra.mxu0 %v679_v2 }
 0x152   :  { %1080 = vmatprep.subr.mxu0 %v1350_v0 }
 0x153   :  { %1081 = vmatpush3.msra.mxu0 %v678_v3 }
 0x154   :  { %1082 = vmatprep.subr.mxu0 %v1350_v0 }
 0x155   :  { %1083 = vmatpush3.msra.mxu0 %v677_v4 }
 0x156   :  { %1084 = vmatprep.subr.mxu0 %v1350_v0 }
 0x157   :  { %1085 = vmatpush3.msra.mxu0 %v676_v5 }
 0x158   :  { %1086 = vmatprep.subr.mxu0 %v1350_v0 }
 0x159   :  { %1087 = vmatpush3.msra.mxu0 %v675_v11 }
 0x15a   :  { %1088 = vmatprep.subr.mxu0 %v1350_v0 }
 0x15b   :  { %1089 = vmatpush3.msra.mxu0 %v674_v13 }
 0x15c   :  { %1090 = vmatprep.subr.mxu0 %v1350_v0 }
 0x15d   :  { %1091 = vmatpush3.msra.mxu0 %v673_v15 }
 0x15e   :  { %1092 = vmatprep.subr.mxu0 %v1350_v0 }
 0x15f   :  { %1093 = vmatpush3.msra.mxu0 %v672_v16 }
 0x160   :  { %1094 = vmatprep.subr.mxu0 %v1350_v0 }
 0x161   :  { %1095 = vmatpush3.msra.mxu0 %v671_v17 }
 0x1fa   :  { %v411_v6 = vpop.f32.mrf.mxu0 }
 0x1fb   :  { %v415_v7 = vmax.f32 %v411_v6, 1e-08 }
 0x1fc   :  { %v1006_v8 = vpop.f32.mrf.mxu0 }
 0x1fd   :  { %1147 = vrcp.f32 %v415_v7 }
 0x202   :  { %v657_v12 = vpop.f32.mrf.mxu0 }
 0x204   :  { %v1063_v14 = vpop.f32.mrf.mxu0 }
 0x20a   :  { %v1148_v9 = vpop.eup %1147 }
 0x20b   :  { %v417_v10 = vmul.f32 %v1148_v9, %v1575_v39  ;;  %v766_v39 = vld [vmem:[%s1707_s14 + $0x8] sm:$0xff] }
 0x20d   :  { %1051 = vmatmul.mubr.f32.vlgmr.msra.gmra.mxu1 %v417_v10 }
 0x20e   :  { %1131 = vmatprep.mubr.msk.f32.mxu1 %vm1351_vm0, %v1350_v0  ;;  %1100 = vmatpush3.msra.mxu1 %v780_v18 }
 0x20f   :  { %1101 = vmatprep.subr.mxu1 %v1350_v0 }
 0x210   :  { %1102 = vmatpush3.msra.mxu1 %v779_v19 }
 0x211   :  { %1103 = vmatprep.subr.mxu1 %v1350_v0 }
 0x212   :  { %1104 = vmatpush3.msra.mxu1 %v778_v20 }
 0x213   :  { %1105 = vmatprep.subr.mxu1 %v1350_v0 }
 0x214   :  { %1106 = vmatpush3.msra.mxu1 %v777_v21 }
 0x215   :  { %1107 = vmatprep.subr.mxu1 %v1350_v0 }
 0x216   :  { %1108 = vmatpush3.msra.mxu1 %v776_v22 }
 0x217   :  { %1109 = vmatprep.subr.mxu1 %v1350_v0 }
 0x218   :  { %1110 = vmatpush3.msra.mxu1 %v775_v23 }
 0x219   :  { %1111 = vmatprep.subr.mxu1 %v1350_v0 }
 0x21a   :  { %1112 = vmatpush3.msra.mxu1 %v774_v24 }
 0x21b   :  { %1113 = vmatprep.subr.mxu1 %v1350_v0 }
 0x21c   :  { %1114 = vmatpush3.msra.mxu1 %v773_v25 }
 0x21d   :  { %1115 = vmatprep.subr.mxu1 %v1350_v0 }
 0x21e   :  { %1116 = vmatpush3.msra.mxu1 %v772_v26 }
 0x21f   :  { %1117 = vmatprep.subr.mxu1 %v1350_v0 }
 0x220   :  { %1118 = vmatpush3.msra.mxu1 %v771_v27 }
 0x221   :  { %1119 = vmatprep.subr.mxu1 %v1350_v0 }
 0x222   :  { %1120 = vmatpush3.msra.mxu1 %v770_v28 }
 0x223   :  { %1121 = vmatprep.subr.mxu1 %v1350_v0 }
 0x224   :  { %1122 = vmatpush3.msra.mxu1 %v769_v29 }
 0x225   :  { %1123 = vmatprep.subr.mxu1 %v1350_v0 }
 0x226   :  { %1124 = vmatpush3.msra.mxu1 %v768_v30 }
 0x227   :  { %1125 = vmatprep.subr.mxu1 %v1350_v0 }
 0x228   :  { %1126 = vmatpush3.msra.mxu1 %v767_v38 }
 0x229   :  { %1127 = vmatprep.subr.mxu1 %v1350_v0 }
 0x22a   :  { %1128 = vmatpush3.msra.mxu1 %v766_v39 }
 0x22b   :  { %1129 = vmatprep.subr.mxu1 %v1350_v0 }
 0x22c   :  { %1130 = vmatpush3.msra.mxu1 %v765_v40 }
 0x2cd   :  { %v579_v31 = vpop.f32.mrf.mxu1 }
 0x2ce   :  { %v580_v32 = vadd.f32 %v579_v31, %v1594_v56 }
 0x2cf   :  { %v1052_v34 = vpop.f32.mrf.mxu1 }
 0x2d0   :  { %v661_v35 = vadd.f32 %v657_v12, %v580_v32 }
 0x2d2   :  { %v669_v36 = vadd.f32 %v874_v33, %v661_v35 }
 0x2d4   :  { %v670_v37 = vmax.f32 %v669_v36, 0.0 }
 0x2d6   :  { %1097 = vmatmul.mubr.f32.vlgmr.msra.gmra.mxu0 %v670_v37 }
 0x396   :  { %v760_v42 = vpop.f32.mrf.mxu0 }
 0x397   :  { %v761_v43 = vadd.f32 %v875_v41, %v760_v42 }
 0x398   :  { %v1098_v44 = vpop.f32.mrf.mxu0 }
 0x399   :  { %v764_v45 = vmax.f32 %v761_v43, 0.0 }
 0x39b   :  { %1132 = vmatmul.mubr.f32.vlgmr.msra.gmra.mxu1 %v764_v45 }
 0x45b   :  { %v854_v47 = vpop.f32.mrf.mxu1 }
 0x45c   :  { %v855_v0 = vadd.f32 %v876_v46, %v854_v47 }
 0x45d   :  { %v1133_v48 = vpop.f32.mrf.mxu1 }
 0x45e   :  { %859 = vst.msk [vmem:[%s1709_s16] sm:$0xff] %vm858_vm4, %v855_v0 }
 0x45f   :  { %864 = vsyncpa [#allocation3], 1 }
 0x460   :  { %865 = vsyncpa [#allocation5], 1 }
 0x461   :  { %866 = vsyncpa [#allocation8], 1 }
 0x462   :  { %867 = vsyncpa [#allocation11], 1 }
 0x463   :  { %868 = vsyncpa [#allocation14], 1 }

</bundles_post_ra>
